<compile_context>
chip_gen: v5e
topology: v5e:2x2
jax: 0.10.0
libtpu: 0.0.40
codegen_flags: <defaults>
</compile_context>

<pallas_src>
import functools

import numpy as np

import jax
import jax.numpy as jnp
from jax.experimental import pallas as pl
from jax.experimental.pallas import tpu as pltpu


def _round_up(x, n):
    return ((x + n - 1) // n) * n


def _vmem():
    return pl.BlockSpec(memory_space=pltpu.MemorySpace.VMEM)


# ----------------------------------------------------------------------------
# One-time probe: which way does pltpu.roll rotate on this backend?
#   dir = +1  ->  roll(x, s)[i] == x[(i + s) % n]
#   dir = -1  ->  roll(x, s)[i] == x[(i - s) % n]   (jnp.roll convention)
# ----------------------------------------------------------------------------
_ROLL_DIR = None


def _roll_probe_kernel(x_ref, o_ref):
    o_ref[...] = pltpu.roll(x_ref[...], 1, axis=1)


def _detect_roll_direction():
    global _ROLL_DIR
    if _ROLL_DIR is None:
        x = jax.lax.broadcasted_iota(jnp.float32, (8, 128), 1)
        y = pl.pallas_call(
            _roll_probe_kernel,
            out_shape=jax.ShapeDtypeStruct((8, 128), jnp.float32),
            in_specs=[_vmem()],
            out_specs=_vmem(),
        )(x)
        val = float(y[0, 1])
        _ROLL_DIR = 1 if abs(val - 2.0) < 0.5 else -1
    return _ROLL_DIR


# ----------------------------------------------------------------------------
# Compile-time constants: per-tap boundary masks and lane offsets.
# Output position p = b*H*W + h*W + w reads input p + (dy-1)*W + (dx-1) when the
# tap lies inside the image; otherwise the tap contributes zero (masked).
# ----------------------------------------------------------------------------
def _build_tap_tables(batch, height, width, m_pad):
    hw = height * width
    m = batch * hw
    p = np.arange(m)
    h = (p % hw) // width
    w = p % width
    masks = np.zeros((9, 1, m_pad), np.float32)
    offsets = []
    for dy in range(3):
        for dx in range(3):
            t = dy * 3 + dx
            valid = ((h + dy - 1 >= 0) & (h + dy - 1 < height) &
                     (w + dx - 1 >= 0) & (w + dx - 1 < width))
            masks[t, 0, :m] = valid.astype(np.float32)
            offsets.append((dy - 1) * width + (dx - 1))
    return masks, offsets


# ----------------------------------------------------------------------------
# The fused kernel: stem + residual tower + both heads, everything VMEM-resident.
# Activation layout: (C, M_PAD)  — channels on sublanes, positions on lanes.
# ----------------------------------------------------------------------------
def _fused_resnet_kernel(
    x_ref,          # (C_IN_PAD, M_PAD) f32
    mask_ref,       # (9, 1, M_PAD)     bf16  per-tap boundary masks
    stem_w_ref,     # (CH, 9*C_IN_PAD)  bf16  fused stem conv weight
    stem_s_ref,     # (CH, 1) f32   folded-BN scale
    stem_b_ref,     # (CH, 1) f32   folded-BN bias
    tower_w_ref,    # (L, CH, 9*CH) bf16   fused tower conv weights
    tower_s_ref,    # (L, CH, 1) f32
    tower_b_ref,    # (L, CH, 1) f32
    head_w_ref,     # (3, CH) bf16   rows: [policy c0, policy c1, value c0]
    head_s_ref,     # (3, 1) f32
    head_b_ref,     # (3, 1) f32
    p_sel_ref,      # (2, M_PAD, OUT_PAD) bf16  policy flatten+FC selection
    v_sel2_ref,     # (M_PAD, B*move_hidden) bf16
    v_bias2_ref,    # (1, B*move_hidden) f32
    v_sel3_ref,     # (B*move_hidden, OUT_PAD) bf16
    out_bias_ref,   # (1, OUT_PAD) f32   policy/value biases in the output row
    out_ref,        # out (1, OUT_PAD) f32
    *, depth, block_depth, shifts):
    f32, bf16 = jnp.float32, jnp.bfloat16

    def conv3x3(act16, w_fused):
        """3x3/pad=1 conv: 9 lane rolls + masks (XLU/VPU) -> one K=9*C matmul (MXU)."""
        taps = []
        for t, s in enumerate(shifts):
            rolled = act16 if s == 0 else pltpu.roll(act16, s, axis=1)
            taps.append(rolled * mask_ref[t])        # bf16, zero out invalid taps
        stacked = jnp.concatenate(taps, axis=0)      # (9*C, M_PAD) bf16
        return jnp.dot(w_fused, stacked, preferred_element_type=f32)

    # --- stem: conv3x3 + folded-BN + ReLU ------------------------------------
    act = conv3x3(x_ref[...].astype(bf16), stem_w_ref[...])
    act = jnp.maximum(act * stem_s_ref[...] + stem_b_ref[...], 0.0)

    # --- residual tower (ResBlockAZ semantics) -------------------------------
    li = 0
    for _ in range(depth):
        res = act
        for i in range(block_depth):
            y = conv3x3(act.astype(bf16), tower_w_ref[li])
            y = y * tower_s_ref[li] + tower_b_ref[li]
            if i < block_depth - 1:
                act = jnp.maximum(y, 0.0)
            else:
                act = jnp.maximum(y + res, 0.0)      # relu(h + x)
            li += 1

    # --- heads: policy(2ch) + value(1ch) 1x1 convs fused into one matmul -----
    act16 = act.astype(bf16)
    hd = jnp.dot(head_w_ref[...], act16, preferred_element_type=f32)   # (3, M_PAD)
    hd = jnp.maximum(hd * head_s_ref[...] + head_b_ref[...], 0.0)
    hd0 = hd[0:1, :].astype(bf16)
    hd1 = hd[1:2, :].astype(bf16)
    hd2 = hd[2:3, :].astype(bf16)

    # policy: NCHW flatten + Linear folded into block-diagonal selection matmuls
    hp = (jnp.dot(hd0, p_sel_ref[0], preferred_element_type=f32)
          + jnp.dot(hd1, p_sel_ref[1], preferred_element_type=f32))
    # value: flatten + Linear + ReLU + Linear (block-diagonal, output at lane 64+)
    hv1 = jnp.maximum(
        jnp.dot(hd2, v_sel2_ref[...], preferred_element_type=f32)
        + v_bias2_ref[...], 0.0)
    hv = jnp.dot(hv1.astype(bf16), v_sel3_ref[...], preferred_element_type=f32)

    # single lane-dense (1, OUT_PAD) row: [policy | value | zero pad]
    out_ref[...] = (hp + hv + out_bias_ref[...]).astype(out_ref.dtype)


# ----------------------------------------------------------------------------
# One-time preparation of all kernel constants (hoisted out of the forward).
# ----------------------------------------------------------------------------
def _prepare_inference(params, batch, c_in, height, width, depth, block_depth):
    f32, bf16 = jnp.float32, jnp.bfloat16
    hw = height * width
    m = batch * hw
    m_pad = _round_up(max(m, 128), 128)
    ch = params["conv1_w"].shape[1]
    c_in_pad = _round_up(c_in, 16)                   # bf16 sublane-tile alignment
    move_dim = params["p_fc2_w"].shape[0]
    move_hidden = params["v_fc2_w"].shape[0]
    out_pad = _round_up(max(batch * move_dim + batch * 2, 128), 128)
    n_layers = depth * block_depth

    roll_dir = _detect_roll_direction()
    masks_np, offsets = _build_tap_tables(batch, height, width, m_pad)
    shifts = tuple(int((roll_dir * o) % m_pad) for o in offsets)

    def fuse_taps(w_taps, cin_pad):
        # (9, cout, cin) tap-major conv weight -> (cout, 9*cin_pad) fused matmul weight
        cin = w_taps.shape[2]
        w = jnp.pad(w_taps.astype(f32), ((0, 0), (0, 0), (0, cin_pad - cin)))
        cout = w.shape[1]
        return jnp.transpose(w, (1, 0, 2)).reshape(cout, 9 * cin_pad).astype(bf16)

    prep = {
        "masks": jnp.asarray(masks_np, bf16),
        "stem_w": fuse_taps(params["conv1_w"], c_in_pad),
        "stem_s": params["conv1_scale"].reshape(ch, 1).astype(f32),
        "stem_b": params["conv1_bias"].reshape(ch, 1).astype(f32),
        "tower_w": jnp.stack([fuse_taps(params["tower_w"][l], ch)
                              for l in range(n_layers)], axis=0),
        "tower_s": params["tower_scale"].reshape(n_layers, ch, 1).astype(f32),
        "tower_b": params["tower_bias"].reshape(n_layers, ch, 1).astype(f32),
        "head_w": jnp.concatenate([params["p_conv1_w"], params["v_conv1_w"]],
                                  axis=0).astype(bf16),
        "head_s": jnp.concatenate([params["p_conv1_scale"],
                                   params["v_conv1_scale"]], 0).reshape(3, 1).astype(f32),
        "head_b": jnp.concatenate([params["p_conv1_bias"],
                                   params["v_conv1_bias"]], 0).reshape(3, 1).astype(f32),
    }

    # Fold PyTorch's NCHW .view(B, -1) flatten + Linear into block-diagonal selection
    # matrices (padded to M_PAD rows / OUT_PAD lane-dense output columns).
    eye_b = jnp.eye(batch, dtype=f32)
    wp = params["p_fc2_w"].reshape(move_dim, 2, hw)
    p_sel = []
    for c in range(2):
        sel = jnp.kron(eye_b, jnp.transpose(wp[:, c, :]))          # (m, B*move_dim)
        p_sel.append(jnp.pad(sel, ((0, m_pad - m),
                                   (0, out_pad - batch * move_dim))))
    prep["p_sel"] = jnp.stack(p_sel, axis=0).astype(bf16)

    v_sel2 = jnp.kron(eye_b, jnp.transpose(params["v_fc2_w"]))     # (m, B*move_hidden)
    prep["v_sel2"] = jnp.pad(v_sel2, ((0, m_pad - m), (0, 0))).astype(bf16)
    prep["v_bias2"] = jnp.tile(params["v_fc2_b"][None, :], (1, batch)).astype(f32)

    v_sel3 = jnp.zeros((batch * move_hidden, out_pad), f32)
    v_sel3 = v_sel3.at[:, batch * move_dim:batch * move_dim + 2 * batch].set(
        jnp.kron(eye_b, jnp.transpose(params["v_fc3_w"])))
    prep["v_sel3"] = v_sel3.astype(bf16)

    out_bias = jnp.zeros((1, out_pad), f32)
    out_bias = out_bias.at[:, :batch * move_dim].set(
        jnp.tile(params["p_fc2_b"][None, :], (1, batch)))
    out_bias = out_bias.at[:, batch * move_dim:batch * move_dim + 2 * batch].set(
        jnp.tile(params["v_fc3_b"][None, :], (1, batch)))
    prep["out_bias"] = out_bias

    cfg = dict(batch=batch, c_in=c_in, c_in_pad=c_in_pad, m=m, m_pad=m_pad,
               depth=depth, block_depth=block_depth, move_dim=move_dim,
               out_pad=out_pad, shifts=shifts)
    return prep, cfg


def _forward_impl(prep, cfg, x_nchw):
    f32 = jnp.float32
    b, c_in, m, m_pad = cfg["batch"], cfg["c_in"], cfg["m"], cfg["m_pad"]
    # NCHW -> (C_in, B*H*W), then pad channels/lanes to the kernel layout.
    x_t = jnp.transpose(x_nchw.astype(f32), (1, 0, 2, 3)).reshape(c_in, m)
    x_t = jnp.pad(x_t, ((0, cfg["c_in_pad"] - c_in), (0, m_pad - m)))

    kernel = functools.partial(_fused_resnet_kernel, depth=cfg["depth"],
                               block_depth=cfg["block_depth"], shifts=cfg["shifts"])
    out = pl.pallas_call(
        kernel,
        out_shape=jax.ShapeDtypeStruct((1, cfg["out_pad"]), f32),
        in_specs=[_vmem()] * 16,
        out_specs=_vmem(),
    )(x_t, prep["masks"],
      prep["stem_w"], prep["stem_s"], prep["stem_b"],
      prep["tower_w"], prep["tower_s"], prep["tower_b"],
      prep["head_w"], prep["head_s"], prep["head_b"],
      prep["p_sel"], prep["v_sel2"], prep["v_bias2"], prep["v_sel3"],
      prep["out_bias"])

    bm = b * cfg["move_dim"]
    hp = out[:, :bm].reshape(b, cfg["move_dim"])
    hv = out[:, bm:bm + 2 * b].reshape(b, 2)
    return hp, hv


def make_forward_fn(params, *, batch, c_in, height, width, depth, block_depth):
    """Prepare all kernel constants once and return a jitted forward fn."""
    prep, cfg = _prepare_inference(params, batch, c_in, height, width,
                                   depth, block_depth)

    @jax.jit
    def _fwd(prep_arrays, x):
        return _forward_impl(prep_arrays, cfg, x)

    return lambda x: _fwd(prep, x)


# ----------------------------------------------------------------------------
# Pure-JAX f32 reference (matches ResNetAZ.forward with folded inference BN).
# ----------------------------------------------------------------------------
def reference_forward(params, x, *, depth, block_depth):
    def conv3x3(h, w_taps):   # w_taps: (9, cout, cin), tap t = ky*3 + kx
        cout, cin = w_taps.shape[1], w_taps.shape[2]
        w = jnp.transpose(w_taps.reshape(3, 3, cout, cin), (2, 3, 0, 1))  # OIHW
        return jax.lax.conv_general_dilated(
            h, w, window_strides=(1, 1), padding=((1, 1), (1, 1)),
            dimension_numbers=("NCHW", "OIHW", "NCHW"))

    def bn(h, scale, bias):
        return h * scale[None, :, None, None] + bias[None, :, None, None]

    h = jax.nn.relu(bn(conv3x3(x, params["conv1_w"]),
                       params["conv1_scale"], params["conv1_bias"]))
    li = 0
    for _ in range(depth):
        res = h
        for i in range(block_depth):
            y = bn(conv3x3(h, params["tower_w"][li]),
                   params["tower_scale"][li], params["tower_bias"][li])
            h = jax.nn.relu(y) if i < block_depth - 1 else jax.nn.relu(y + res)
            li += 1
    b = x.shape[0]
    hp = jnp.einsum("oc,bchw->bohw", params["p_conv1_w"], h)
    hp = jax.nn.relu(bn(hp, params["p_conv1_scale"], params["p_conv1_bias"]))
    hp = hp.reshape(b, -1) @ params["p_fc2_w"].T + params["p_fc2_b"]
    hv = jnp.einsum("oc,bchw->bohw", params["v_conv1_w"], h)
    hv = jax.nn.relu(bn(hv, params["v_conv1_scale"], params["v_conv1_bias"]))
    hv = jax.nn.relu(hv.reshape(b, -1) @ params["v_fc2_w"].T + params["v_fc2_b"])
    hv = hv @ params["v_fc3_w"].T + params["v_fc3_b"]
    return hp, hv


# ----------------------------------------------------------------------------
# Parameters (deterministic synthetic init; BatchNorm folded to scale/bias).
# ----------------------------------------------------------------------------
def init_params(key, c_in, ch, depth, block_depth, move_dim, move_hidden):
    keys = iter(jax.random.split(key, 128))

    def conv_taps(cin, cout):
        # torch Conv2d weight (cout, cin, 3, 3) rearranged tap-major: (9, cout, cin)
        return 0.1 * jax.random.normal(next(keys), (9, cout, cin), jnp.float32)

    def folded_bn(c, eps=1e-5):
        gamma = 1.0 + 0.1 * jax.random.normal(next(keys), (c,), jnp.float32)
        beta = 0.1 * jax.random.normal(next(keys), (c,), jnp.float32)
        mean = 0.1 * jax.random.normal(next(keys), (c,), jnp.float32)
        var = 1.0 + 0.1 * jnp.abs(jax.random.normal(next(keys), (c,), jnp.float32))
        scale = gamma / jnp.sqrt(var + eps)
        return scale, beta - mean * scale

    def linear(n_out, n_in):
        w = 0.1 * jax.random.normal(next(keys), (n_out, n_in), jnp.float32)
        bvec = 0.1 * jax.random.normal(next(keys), (n_out,), jnp.float32)
        return w, bvec

    p = {}
    p["conv1_w"] = conv_taps(c_in, ch)
    p["conv1_scale"], p["conv1_bias"] = folded_bn(ch)
    tw, ts, tb = [], [], []
    for _ in range(depth * block_depth):
        tw.append(conv_taps(ch, ch))
        s, bb = folded_bn(ch)
        ts.append(s)
        tb.append(bb)
    p["tower_w"] = jnp.stack(tw, axis=0)        # (L, 9, ch, ch)
    p["tower_scale"] = jnp.stack(ts, axis=0)    # (L, ch)
    p["tower_bias"] = jnp.stack(tb, axis=0)
    p["p_conv1_w"] = 0.1 * jax.random.normal(next(keys), (2, ch), jnp.float32)
    p["p_conv1_scale"], p["p_conv1_bias"] = folded_bn(2)
    p["p_fc2_w"], p["p_fc2_b"] = linear(move_dim, 2 * 9 * 9)
    p["v_conv1_w"] = 0.1 * jax.random.normal(next(keys), (1, ch), jnp.float32)
    p["v_conv1_scale"], p["v_conv1_bias"] = folded_bn(1)
    p["v_fc2_w"], p["v_fc2_b"] = linear(move_hidden, 1 * 9 * 9)
    p["v_fc3_w"], p["v_fc3_b"] = linear(2, move_hidden)
    return p


if __name__ == "__main__":
    key = jax.random.PRNGKey(0)
    kp, kx = jax.random.split(key)

    # Board is 9x9 (fixed by the 2*9*9 / 1*9*9 Linear sizes in the module).
    C_IN, CH, DEPTH, BLOCK_DEPTH = 4, 16, 4, 2
    MOVE_DIM, MOVE_HIDDEN = 32, 256
    B, H, W = 2, 9, 9

    params = init_params(kp, C_IN, CH, DEPTH, BLOCK_DEPTH, MOVE_DIM, MOVE_HIDDEN)
    x = jax.random.normal(kx, (B, C_IN, H, W), jnp.float32)   # NCHW input

    fwd = make_forward_fn(params, batch=B, c_in=C_IN, height=H, width=W,
                          depth=DEPTH, block_depth=BLOCK_DEPTH)
    hp, hv = fwd(x)
    jax.block_until_ready((hp, hv))

    assert hp.shape == (B, MOVE_DIM), hp.shape
    assert hv.shape == (B, 2), hv.shape

    # Pure-JAX f32 reference check (kernel uses bf16 matmuls -> loose tolerance).
    hp_ref, hv_ref = reference_forward(params, x, depth=DEPTH, block_depth=BLOCK_DEPTH)
    np.testing.assert_allclose(np.asarray(hp), np.asarray(hp_ref), rtol=0.1, atol=0.08)
    np.testing.assert_allclose(np.asarray(hv), np.asarray(hv_ref), rtol=0.1, atol=0.08)

    print("KERNEL_OK")
</pallas_src>

<mosaic_0001>
module attributes {stable_mosaic.version = 11 : i64} {
  func.func @_roll_probe_kernel(%arg0: memref<8x128xf32, #tpu.memory_space<vmem>>, %arg1: memref<8x128xf32, #tpu.memory_space<vmem>>) attributes {dimension_semantics = [], scalar_prefetch = 0 : i64, scratch_operands = 0 : i64, tpu.core_type = #tpu.core_type<tc>} {
    %c0 = arith.constant 0 : index
    %c0_0 = arith.constant 0 : index
    %0 = vector.load %arg0[%c0, %c0_0] : memref<8x128xf32, #tpu.memory_space<vmem>>, vector<8x128xf32>
    %c1_i32 = arith.constant 1 : i32
    %1 = tpu.dynamic_rotate %0 by %c1_i32 dim 1 : vector<8x128xf32>, i32 -> vector<8x128xf32>
    %c0_1 = arith.constant 0 : index
    %c0_2 = arith.constant 0 : index
    %2 = vector.load %arg1[%c0_1, %c0_2] : memref<8x128xf32, #tpu.memory_space<vmem>>, vector<8x128xf32>
    tpu.vector_store %arg1[%c0_1, %c0_2], %1 {strides = array<i32>} : memref<8x128xf32, #tpu.memory_space<vmem>>, vector<8x128xf32>,
    return
  }
}

</mosaic_0001>

<bundles_post_ra>
// kernel: tpu_custom_call.1
= control target key start
LH: loop header
LB: loop body
LE: loop exit
PB: predicated region body
PF: predicated region fallthrough
CT: control target
= control target key end

     0   :  { %6 = vsyncpa [#allocation3], 0  ;;  %s118_s0 = inlined_call_operand.hbm [shape: f32[8,128], index: 0, kind: input, shape index: {}]   ;;  %s119_s1 = inlined_call_operand.hbm [shape: f32[8,128], index: 1, kind: output, shape index: {}]  }
   0x1   :  { %7 = vsyncpa [#allocation4], 0  ;;  %s13_s8 = sshll.u32 %s118_s0, 4  ;;  %s99_s9 = smov [#allocation2]   ;;  %s14_s8 = int_to_ptr.hbm [resolvable:$true] %s13_s8 }
   0x2   :  { %s15_s10 = sshll.u32 %s99_s9, 4  ;;  %s16_s10 = int_to_ptr.vmem [resolvable:$true] %s15_s10 }
   0x3   :  { %18 = dma.hbm_to_vmem [thread:$0]  %s14_s8, 128, %s16_s10, [#allocation3]  }
   0x4   :  { %95 = dma.done.wait [#allocation3], 128  }
   0x5   :  { %96 = vsyncadd [#allocation3], 4294967168  ;;  %v23_v0 = vld [vmem:[#allocation2] sm:$0xff]  ;;  %s100_s11 = smov 1   ;;  %s101_s12 = smov [#allocation5]  }
   0x6   :  { %24 = vrot.lane.b32.xlu0 %v23_v0, %s100_s11  ;;  %s32_s13 = sshll.u32 %s101_s12, 4  ;;  %s34_s16 = sshll.u32 %s119_s1, 4  ;;  %s33_s13 = int_to_ptr.vmem [resolvable:$true] %s32_s13  ;;  %s35_s16 = int_to_ptr.hbm [resolvable:$true] %s34_s16 }
  0x78   :  { %v25_v1 = vpop.permute.xlu0 %24 }
  0x79   :  { %26 = vst [vmem:[#allocation5] sm:$0xff] %v25_v1 }
  0x7a   :  { %37 = dma.vmem_to_hbm [thread:$0]  %s33_s13, 128, %s35_s16, [#allocation4]  }
  0x7b   :  { %97 = dma.done.wait [#allocation4], 128  }
  0x7c   :  { %98 = vsyncadd [#allocation4], 4294967168 }
  0x7d   :  { %42 = vsyncpa [#allocation3], 1 }
  0x7e   :  { %43 = vsyncpa [#allocation4], 1 }

</bundles_post_ra>
